<compile_context>
chip_gen: v6e
topology: v6e:2x2x1
jax: 0.10.0
libtpu: 0.0.40
codegen_flags: <defaults>
</compile_context>

<pallas_src>
import jax
import jax.numpy as jnp
from jax.experimental import pallas as pl
from jax.experimental.pallas import tpu as pltpu


def _round_up(v, m):
    return ((v + m - 1) // m) * m


def _vmem_budget():
    """Generation-aware VMEM planning: (buffer budget, scoped limit, capacity)."""
    cap = 64 << 20  # conservative fallback (v7x physical VMEM per TC)
    try:
        info = pltpu.get_tpu_info()
        cap = int(getattr(info, "vmem_capacity_bytes", cap))
    except Exception:
        pass
    budget = min(24 << 20, cap // 4)              # 24 MiB on v5e/v6e, 16 MiB on v7x
    limit = min(cap // 2, max(32 << 20, 2 * budget))
    return budget, limit, cap


# ----------------------------------------------------------------------------- kernels


def _gaussian_batch_on_lanes_kernel(x_ref, mu_ref, w_ref, o_ref):
    """Large-B / small-N path. Output tile is lane-dense along the batch axis.

    x_ref : (TB, N)    natural-layout batch tile (contiguous HBM read)
    mu_ref: (M, N, 1)  means                      (VMEM resident across steps)
    w_ref : (M, N, 1)  -0.5 / sigma**2            (VMEM resident across steps)
    o_ref : (M, N, TB) output tile, batch on lanes -> unmasked full-lane stores
    """
    # In-kernel transpose: batch moves onto the lane axis.  Runs on the XLU slot,
    # which is idle in this DMA-bound kernel, and saves a wrapper x.T HBM pass.
    xt = jnp.transpose(x_ref[...], (1, 0))                 # (N, TB)
    n_memberships = mu_ref.shape[0]
    # TODO(synk): switch to lax.fori_loop + dynamic o_ref[m] for very large M
    # (static unroll is best for the typical handful of memberships).
    for m in range(n_memberships):
        d = xt - mu_ref[m]                                 # (N, TB) - (N, 1) broadcast
        o_ref[m] = jnp.exp(d * d * w_ref[m]).astype(o_ref.dtype)


def _gaussian_natural_kernel(x_ref, mu_ref, w_ref, o_ref):
    """Small-B or N>=128 path: writes the PyTorch (B, M, N) layout directly.

    x_ref : (TB, N);  mu_ref, w_ref: (M, N);  o_ref: (TB, M, N)
    """
    x = x_ref[...][:, None, :]                             # (TB, 1, N)
    mu = mu_ref[...][None, :, :]                           # (1, M, N)
    w = w_ref[...][None, :, :]                             # (1, M, N)
    d = x - mu                                             # (TB, M, N)
    o_ref[...] = jnp.exp(d * d * w).astype(o_ref.dtype)


# ------------------------------------------------------------------------- tile sizing


def _plan_batch_on_lanes(B, M, N, budget, max_tb):
    """Batch-tile size + VMEM-footprint estimate for the batch-on-lanes kernel."""
    rN8, rN128 = _round_up(N, 8), _round_up(N, 128)
    # mu / w: (M, N, 1) blocks, last dim lane-padded to 128, double-buffered, 2 arrays.
    resident = 2 * 2 * M * rN8 * 128 * 4
    # Per batch column of the tile:
    per_col = (2 * M * rN8      # output block double-buffer
               + 3 * rN8        # xt value + ~2 per-membership temporaries
               + 3 * rN128      # x block double-buffer + loaded x value (lane-padded)
               ) * 4
    avail = max(budget - resident, per_col)
    tb = min(B, max_tb, max(avail // per_col, 128))
    # Keep >= 4 grid steps when B is large (v7x megacore sharding + DMA pipelining),
    # but never below 2048 rows/step (amortize the ~0.35us per-grid-step overhead).
    if B > 4 * 2048:
        tb = min(tb, max(2048, B // 4))
    tb = B if tb >= B else max(128, (tb // 128) * 128)
    return tb, resident + per_col * tb


def _plan_natural(B, M, N, budget, max_tb):
    """Batch-tile size + VMEM-footprint estimate for the natural-layout kernel."""
    rM8, rN128 = _round_up(M, 8), _round_up(N, 128)
    resident = 2 * 2 * rM8 * rN128 * 4                     # mu + w blocks
    per_row = (6 * rM8 * rN128                             # out double-buffer + bcast temps
               + 3 * rN128                                 # x double-buffer + value
               ) * 4
    avail = max(budget - resident, per_row)
    tb = min(B, max_tb, max(avail // per_row, 8))
    tb = B if tb >= B else max(8, (tb // 8) * 8)
    return tb, resident + per_row * tb


# ----------------------------------------------------------------------------- wrapper


def gaussian_layer_forward(x, mu, sigma, sigma_scale=None, *,
                           out_dtype=jnp.float32, transposed_output=False,
                           max_batch_tile=16384):
    """Pallas equivalent of GaussianLayer.forward.

    x: (B, n_inputs);  mu, sigma: (n_memberships, n_inputs).
    Returns (B, n_memberships, n_inputs) by default, or the kernel-native
    (n_memberships, n_inputs, B) layout when transposed_output=True, which skips a
    full-output HBM transpose pass (use it if the consumer can take that layout,
    e.g. a rule firing-strength reduction over n_inputs).
    """
    if sigma_scale is not None:
        sigma = sigma * sigma_scale                        # matches `self.sigma * sigma_scale`

    x = x.astype(jnp.float32)
    mu = mu.astype(jnp.float32)
    sigma = sigma.astype(jnp.float32)

    B, N = x.shape
    M, N2 = mu.shape
    assert N == N2 and sigma.shape == (M, N)

    # exp(-0.5*((x-mu)/sigma)^2) == exp((x-mu)^2 * w), w = -0.5*(1/sigma)^2.
    # The 1/sigma form avoids sigma**2 underflow for tiny sigma; sigma == 0 still
    # gives 0 (or NaN when x == mu), exactly like the torch formula.
    inv_sigma = 1.0 / sigma
    w = -0.5 * inv_sigma * inv_sigma

    budget, vmem_limit, vmem_cap = _vmem_budget()
    use_natural = (B < 128) or (N >= 128)

    if use_natural:
        tb, est = _plan_natural(B, M, N, budget, max_batch_tile)
        vmem_limit = min(vmem_cap * 9 // 10, max(vmem_limit, est + (2 << 20)))
        out = pl.pallas_call(
            _gaussian_natural_kernel,
            out_shape=jax.ShapeDtypeStruct((B, M, N), out_dtype),
            grid_spec=pltpu.PrefetchScalarGridSpec(
                num_scalar_prefetch=0,
                grid=(pl.cdiv(B, tb),),
                in_specs=[
                    pl.BlockSpec((tb, N), lambda b: (b, 0)),      # x batch tile
                    pl.BlockSpec((M, N), lambda b: (0, 0)),       # mu (resident)
                    pl.BlockSpec((M, N), lambda b: (0, 0)),       # -0.5/sigma^2 (resident)
                ],
                out_specs=pl.BlockSpec((tb, M, N), lambda b: (b, 0, 0)),
            ),
            compiler_params=pltpu.CompilerParams(
                dimension_semantics=("parallel",),
                vmem_limit_bytes=int(vmem_limit),
            ),
        )(x, mu, w)
        return jnp.transpose(out, (1, 2, 0)) if transposed_output else out

    # Large batch with small n_inputs: batch-on-lanes kernel.
    tb, est = _plan_batch_on_lanes(B, M, N, budget, max_batch_tile)
    # Guard: if even the minimal tile overshoots the budget (huge M*N), raise the
    # scoped-VMEM limit to the real footprint instead of silently overflowing it.
    # TODO(synk): add an M/N grid axis for configs where even that exceeds physical VMEM.
    vmem_limit = min(vmem_cap * 9 // 10, max(vmem_limit, est + (2 << 20)))

    mu3 = mu.reshape(M, N, 1)
    w3 = w.reshape(M, N, 1)

    out_t = pl.pallas_call(
        _gaussian_batch_on_lanes_kernel,
        out_shape=jax.ShapeDtypeStruct((M, N, B), out_dtype),
        grid_spec=pltpu.PrefetchScalarGridSpec(
            num_scalar_prefetch=0,
            grid=(pl.cdiv(B, tb),),
            in_specs=[
                pl.BlockSpec((tb, N), lambda b: (b, 0)),          # x batch tile (natural)
                pl.BlockSpec((M, N, 1), lambda b: (0, 0, 0)),     # mu (resident)
                pl.BlockSpec((M, N, 1), lambda b: (0, 0, 0)),     # -0.5/sigma^2 (resident)
            ],
            # NOTE: if xprof shows exposed output writeback, try
            # pipeline_mode=pl.Buffered(3) here (check VMEM headroom first).
            out_specs=pl.BlockSpec((M, N, tb), lambda b: (0, 0, b)),
        ),
        compiler_params=pltpu.CompilerParams(
            dimension_semantics=("parallel",),   # batch tiles shard across v7x's 2 TCs
            vmem_limit_bytes=int(vmem_limit),
        ),
    )(x, mu3, w3)

    if transposed_output:
        return out_t
    # (M, N, B) -> (B, M, N) to match the PyTorch layout.  This is the largest
    # remaining HBM cost (re-reads + re-writes the whole output); pass
    # transposed_output=True if the consumer can take the kernel-native layout.
    return jnp.transpose(out_t, (2, 0, 1))


def gaussian_layer_reference(x, mu, sigma, sigma_scale=None):
    """Mirrors the PyTorch formula exactly: exp(-((x - mu) / sigma)**2 / 2)."""
    if sigma_scale is not None:
        sigma = sigma * sigma_scale
    d = (x[:, None, :] - mu[None, :, :]) / sigma[None, :, :]
    return jnp.exp(-0.5 * d * d)


if __name__ == "__main__":
    # Module config consistent with the forward: n_memberships=4, n_inputs=16
    n_memberships, n_inputs = 4, 16

    key = jax.random.PRNGKey(0)
    k_x, k_x2, k_mu, k_sigma = jax.random.split(key, 4)

    # Deterministic parameter init mirroring torch.rand(...) in initialize_gaussians
    mu = jax.random.uniform(k_mu, (n_memberships, n_inputs), dtype=jnp.float32)
    sigma = jax.random.uniform(k_sigma, (n_memberships, n_inputs), dtype=jnp.float32)
    sigma = sigma * 0.9 + 0.1        # keep away from exact zero (avoid 0/0 NaNs)

    # --- small batch: natural (B, M, N) path, zero transposes ---
    batch = 2
    x = jax.random.normal(k_x, (batch, n_inputs), dtype=jnp.float32)
    out = jax.block_until_ready(gaussian_layer_forward(x, mu, sigma))
    ref = gaussian_layer_reference(x, mu, sigma)
    assert out.shape == (batch, n_memberships, n_inputs)
    assert jnp.allclose(out, ref, atol=2e-6, rtol=2e-5)

    out_s = jax.block_until_ready(gaussian_layer_forward(x, mu, sigma, sigma_scale=2.0))
    ref_s = gaussian_layer_reference(x, mu, sigma, sigma_scale=2.0)
    assert jnp.allclose(out_s, ref_s, atol=2e-6, rtol=2e-5)

    # optional bf16 output (halves store traffic on the store-bound kernel)
    out_bf16 = jax.block_until_ready(
        gaussian_layer_forward(x, mu, sigma, out_dtype=jnp.bfloat16))
    assert jnp.allclose(out_bf16.astype(jnp.float32), ref, atol=1e-2, rtol=1e-2)

    # --- larger batch, small n_inputs: batch-on-lanes path, tiled grid w/ partial tail ---
    batch2 = 640
    x2 = jax.random.normal(k_x2, (batch2, n_inputs), dtype=jnp.float32)
    out2 = jax.block_until_ready(
        gaussian_layer_forward(x2, mu, sigma, max_batch_tile=256))   # grid=(3,)
    ref2 = gaussian_layer_reference(x2, mu, sigma)
    assert out2.shape == (batch2, n_memberships, n_inputs)
    assert jnp.allclose(out2, ref2, atol=2e-6, rtol=2e-5)

    # kernel-native (M, N, B) layout: skips the final output transpose pass
    out2_t = jax.block_until_ready(
        gaussian_layer_forward(x2, mu, sigma, max_batch_tile=256, transposed_output=True))
    assert out2_t.shape == (n_memberships, n_inputs, batch2)
    assert jnp.allclose(out2_t, jnp.transpose(ref2, (1, 2, 0)), atol=2e-6, rtol=2e-5)

    print("KERNEL_OK")
</pallas_src>

<mosaic_0001>
module attributes {stable_mosaic.version = 11 : i64} {
  func.func @_gaussian_natural_kernel(%arg0: i32, %arg1: memref<2x16xf32, #tpu.memory_space<vmem>>, %arg2: memref<4x16xf32, #tpu.memory_space<vmem>>, %arg3: memref<4x16xf32, #tpu.memory_space<vmem>>, %arg4: memref<2x4x16xf32, #tpu.memory_space<vmem>>) attributes {dimension_semantics = [#tpu.dimension_semantics<parallel>], iteration_bounds = array<i64: 1>, scalar_prefetch = 0 : i64, scratch_operands = 0 : i64, tpu.core_type = #tpu.core_type<tc>, window_params = [{transform_indices = @transform_0, window_bounds = array<i64: 2, 16>}, {pipeline_mode = #tpu.pipeline_mode<synchronous>, transform_indices = @transform_1, window_bounds = array<i64: 4, 16>}, {pipeline_mode = #tpu.pipeline_mode<synchronous>, transform_indices = @transform_2, window_bounds = array<i64: 4, 16>}, {transform_indices = @transform_3, window_bounds = array<i64: 2, 4, 16>}]} {
    %c0 = arith.constant 0 : index
    %c0_0 = arith.constant 0 : index
    %0 = vector.load %arg1[%c0, %c0_0] : memref<2x16xf32, #tpu.memory_space<vmem>>, vector<2x16xf32>
    %1 = vector.shape_cast %0 : vector<2x16xf32> to vector<2x1x16xf32>
    %c0_1 = arith.constant 0 : index
    %c0_2 = arith.constant 0 : index
    %2 = vector.load %arg2[%c0_1, %c0_2] : memref<4x16xf32, #tpu.memory_space<vmem>>, vector<4x16xf32>
    %3 = vector.shape_cast %2 : vector<4x16xf32> to vector<1x4x16xf32>
    %c0_3 = arith.constant 0 : index
    %c0_4 = arith.constant 0 : index
    %4 = vector.load %arg3[%c0_3, %c0_4] : memref<4x16xf32, #tpu.memory_space<vmem>>, vector<4x16xf32>
    %5 = vector.shape_cast %4 : vector<4x16xf32> to vector<1x4x16xf32>
    %6 = vector.broadcast %1 : vector<2x1x16xf32> to vector<2x4x16xf32>
    %7 = vector.broadcast %3 : vector<1x4x16xf32> to vector<2x4x16xf32>
    %8 = arith.subf %6, %7 : vector<2x4x16xf32>
    %9 = arith.mulf %8, %8 : vector<2x4x16xf32>
    %10 = vector.broadcast %5 : vector<1x4x16xf32> to vector<2x4x16xf32>
    %11 = arith.mulf %9, %10 : vector<2x4x16xf32>
    %12 = math.exp %11 : vector<2x4x16xf32>
    %c0_5 = arith.constant 0 : index
    %c0_6 = arith.constant 0 : index
    %c0_7 = arith.constant 0 : index
    %13 = vector.load %arg4[%c0_5, %c0_6, %c0_7] : memref<2x4x16xf32, #tpu.memory_space<vmem>>, vector<2x4x16xf32>
    tpu.vector_store %arg4[%c0_5, %c0_6, %c0_7], %12 {strides = array<i32>} : memref<2x4x16xf32, #tpu.memory_space<vmem>>, vector<2x4x16xf32>,
    return
  }
  func.func @transform_0(%arg0: i32) -> (i32, i32) {
    %c0_i32 = arith.constant 0 : i32
    %c0_i32_0 = arith.constant 0 : i32
    return %arg0, %c0_i32 : i32, i32
  }
  func.func @transform_1(%arg0: i32) -> (i32, i32) {
    %c0_i32 = arith.constant 0 : i32
    %c0_i32_0 = arith.constant 0 : i32
    %c0_i32_1 = arith.constant 0 : i32
    return %c0_i32, %c0_i32_0 : i32, i32
  }
  func.func @transform_2(%arg0: i32) -> (i32, i32) {
    %c0_i32 = arith.constant 0 : i32
    %c0_i32_0 = arith.constant 0 : i32
    %c0_i32_1 = arith.constant 0 : i32
    return %c0_i32, %c0_i32_0 : i32, i32
  }
  func.func @transform_3(%arg0: i32) -> (i32, i32, i32) {
    %c0_i32 = arith.constant 0 : i32
    %c0_i32_0 = arith.constant 0 : i32
    %c0_i32_1 = arith.constant 0 : i32
    return %arg0, %c0_i32, %c0_i32_0 : i32, i32, i32
  }
}

</mosaic_0001>

<bundles_post_ra>
// kernel: tpu_custom_call.1
= control target key start
LH: loop header
LB: loop body
LE: loop exit
PB: predicated region body
PF: predicated region fallthrough
CT: control target
= control target key end

     0   :  { %8 = vsyncpa [#allocation3], 0  ;;  %s254_s0 = inlined_call_operand.hbm [shape: f32[2,16], index: 0, kind: input, shape index: {}]   ;;  %s255_s1 = inlined_call_operand.hbm [shape: f32[4,16], index: 1, kind: input, shape index: {}]   ;;  %s256_s2 = inlined_call_operand.hbm [shape: f32[4,16], index: 2, kind: input, shape index: {}]   ;;  %s257_s3 = inlined_call_operand.hbm [shape: f32[2,4,16], index: 3, kind: output, shape index: {}]  }
   0x1   :  { %9 = vsyncpa [#allocation6], 0 }
   0x2   :  { %10 = vsyncpa [#allocation4], 0  ;;  %s215_s12 = smov [#allocation5]   ;;  %s216_s14 = smov [#allocation2]  }
   0x3   :  { %s27_s13 = sshll.u32 %s215_s12, 4  ;;  %s17_s15 = sshll.u32 %s216_s14, 4  ;;  %s28_s13 = int_to_ptr.vmem [resolvable:$true] %s27_s13  ;;  %s18_s15 = int_to_ptr.vmem [resolvable:$true] %s17_s15 }
   0x4   :  { %s137_s16 = scalar_lea.vmem %s28_s13, 64  ;;  %p142_p1 = scmp.lt.s32.totalorder %s28_s13, %s28_s13 }
   0x5   :  { %p138_p0 = scmp.ne.s32.totalorder %s28_s13, %s137_s16  ;;  %p143_p2 = scmp.lt.s32.totalorder %s137_s16, %s137_s16 }
   0x7   :  { %p144_p3 = por %p143_p2, %p142_p1 }
   0x9   :  { %p145_p4 = pnand %p144_p3, %p138_p0 }
   0xb   :  { %148 = shalt.err (!%p145_p4)
}
   0xc   :  { %30 = dma.hbm_to_vmem [thread:$0]  %s255_s1, 64, %s28_s13, [#allocation6]  }
   0xd   :  { %s157_s19 = scalar_lea.vmem %s18_s15, 32  ;;  %p162_p6 = scmp.lt.s32.totalorder %s18_s15, %s18_s15 }
   0xe   :  { %p158_p5 = scmp.ne.s32.totalorder %s18_s15, %s157_s19  ;;  %p163_p7 = scmp.lt.s32.totalorder %s157_s19, %s157_s19 }
  0x10   :  { %p164_p8 = por %p163_p7, %p162_p6 }
  0x12   :  { %p165_p9 = pnand %p164_p8, %p158_p5 }
  0x14   :  { %168 = shalt.err (!%p165_p9)
}
  0x15   :  { %20 = dma.hbm_to_vmem [thread:$0]  %s254_s0, 32, %s18_s15, [#allocation3]  }
  0x16   :  { %s217_s22 = smov [#allocation7]  }
  0x17   :  { %s37_s23 = sshll.u32 %s217_s22, 4  ;;  %s38_s23 = int_to_ptr.vmem [resolvable:$true] %s37_s23 }
  0x18   :  { %s177_s24 = scalar_lea.vmem %s38_s23, 64  ;;  %p182_p11 = scmp.lt.s32.totalorder %s38_s23, %s38_s23 }
  0x19   :  { %p178_p10 = scmp.ne.s32.totalorder %s38_s23, %s177_s24  ;;  %p183_p12 = scmp.lt.s32.totalorder %s177_s24, %s177_s24 }
  0x1b   :  { %p184_p13 = por %p183_p12, %p182_p11 }
  0x1d   :  { %p185_p0 = pnand %p184_p13, %p178_p10 }
  0x1f   :  { %188 = shalt.err (!%p185_p0)
}
  0x20   :  { %40 = dma.hbm_to_vmem [thread:$0]  %s256_s2, 64, %s38_s23, [#allocation6]  }
  0x21   :  { %209 = dma.done.wait [#allocation3], 32  }
  0x22   :  { %210 = vsyncadd [#allocation3], 4294967264 }
  0x23   :  { %211 = dma.done.wait [#allocation6], 128  }
  0x24   :  { %212 = vsyncadd [#allocation6], 4294967168  ;;  %v63_v0 = vlaneseq  ;;  %v218_v1 = vmov 1966171168   ;;  %v74_v10 = vld [vmem:[#allocation5] sm:$0xf] }
  0x25   :  { %v61_v2 = vunpack.c.l.s4 %v218_v1  ;;  %v117_v7 = vld.sshfl [vmem:[#allocation2] sm:$0x11 pattern:$0x75316420]  ;;  %v75_v15 = vld [vmem:[#allocation7] sm:$0xf] }
  0x26   :  { %v64_v3 = vshrl.u32 %v63_v0, 7  ;;  %v59_v9 = vcombine.high %v117_v7, %v117_v7  ;;  %vm96_vm0 = vcmask 125952   ;;  %s219_s0 = smov [#allocation8]  }
  0x27   :  { %v62_v4 = vunpack.c.0.s8 %v61_v2  ;;  %s104_s2 = sshll.u32 %s219_s0, 4  ;;  %s105_s2 = int_to_ptr.vmem [resolvable:$true] %s104_s2 }
  0x28   :  { %v78_v6 = vsub.s32 0, %v64_v3  ;;  %s189_s26 = scalar_lea.vmem %s105_s2, 128  ;;  %p194_p2 = scmp.lt.s32.totalorder %s105_s2, %s105_s2 }
  0x29   :  { %v65_v5 = vsub.s32 %v62_v4, %v64_v3  ;;  %p190_p1 = scmp.ne.s32.totalorder %s105_s2, %s189_s26  ;;  %p195_p3 = scmp.lt.s32.totalorder %s189_s26, %s189_s26 }
  0x2b   :  { %v66_v8 = vrot.slane %v117_v7, %v65_v5  ;;  %v73_v12 = vrot.slane %v59_v9, %v65_v5  ;;  %p196_p4 = por %p195_p3, %p194_p2 }
  0x2d   :  { %v79_v11 = vrot.slane %v66_v8, %v78_v6  ;;  %v83_v14 = vrot.slane %v73_v12, %v78_v6  ;;  %p197_p5 = pnand %p196_p4, %p190_p1 }
  0x2f   :  { %v86_v13 = vsub.f32 %v79_v11, %v74_v10  ;;  %v87_v17 = vsub.f32 %v83_v14, %v74_v10 }
  0x31   :  { %v88_v16 = vmul.f32 %v86_v13, %v86_v13  ;;  %v89_v19 = vmul.f32 %v87_v17, %v87_v17 }
  0x33   :  { %v90_v18 = vmul.f32 %v88_v16, %v75_v15  ;;  %v91_v21 = vmul.f32 %v89_v19, %v75_v15 }
  0x35   :  { %v92_v20 = vmul.f32 1.442695, %v90_v18  ;;  %v94_v22 = vmul.f32 1.442695, %v91_v21 }
  0x37   :  { %125 = vpow2.f32 %v92_v20 }
  0x38   :  { %127 = vpow2.f32 %v94_v22 }
  0x44   :  { %v126_v23 = vpop.eup %125 }
  0x45   :  { %97 = vst.msk [vmem:[#allocation8] sm:$0xf] %vm96_vm0, %v126_v23  ;;  %v128_v24 = vpop.eup %127 }
  0x46   :  { %98 = vst.msk [vmem:[#allocation8 + $0x4] sm:$0xf] %vm96_vm0, %v128_v24 }
  0x47   :  { %200 = shalt.err (!%p197_p5)
}
  0x48   :  { %s220_s27 = smov 64   ;;  %s221_s28 = smov 4  }
  0x49   :  { %110 = dma.vmem_to_hbm [thread:$0]  %s105_s2, 128, %s257_s3, [#allocation4], %s220_s27, %s220_s27, %s221_s28  }
  0x4a   :  { %213 = dma.done.wait [#allocation4], 128  }
  0x4b   :  { %214 = vsyncadd [#allocation4], 4294967168 }
  0x4c   :  { %114 = vsyncpa [#allocation3], 1 }
  0x4d   :  { %115 = vsyncpa [#allocation6], 1 }
  0x4e   :  { %116 = vsyncpa [#allocation4], 1 }

</bundles_post_ra>
